<compile_context>
chip_gen: v7x
topology: tpu7x:2x2x1
jax: 0.10.0
libtpu: 0.0.40
codegen_flags: <defaults>
</compile_context>

<pallas_src>
import math
import functools

import jax
import jax.numpy as jnp
from jax import lax
from jax.experimental import pallas as pl
from jax.experimental.pallas import tpu as pltpu


# MXU operand dtype. f32 keeps the 1e-4 parity asserts below bit-tight.
# TODO(synk): flip to jnp.bfloat16 on bf16-native MXUs (v5e/v6e/v7x) and loosen
# the test tolerance when the surrounding model runs bf16.
_MXU_DTYPE = jnp.float32


@functools.lru_cache(maxsize=None)
def _vmem_limit_bytes():
    """Generation-aware VMEM cap: ~80% of physical per-core VMEM."""
    try:
        cap = int(pltpu.get_tpu_info().vmem_capacity_bytes)
        if cap > 0:
            return int(cap * 0.8)
    except Exception:
        pass
    return 48 * 1024 * 1024  # conservative fallback (fits v7x's 64 MiB/core)


def _mosaic_params(dimension_semantics):
    return pltpu.CompilerParams(
        dimension_semantics=dimension_semantics,
        vmem_limit_bytes=_vmem_limit_bytes(),
    )


def _pick_tile(n, target, mult):
    """Largest tile <= target that divides n and is a multiple of `mult`.

    Falls back to the full dimension (always legal for a BlockSpec) so the
    (8,128) divisibility rule is never violated.
    """
    if n <= target:
        return n
    t = (min(target, n) // mult) * mult
    while t >= mult:
        if n % t == 0:
            return t
        t -= mult
    # TODO(synk): pad + mask ragged shapes instead of falling back to full-dim.
    return n


# ----------------------- Fused QKV projection kernel ----------------------- #

def _qkv_proj_kernel(x_ref, wq_ref, wk_ref, wv_ref, bq_ref, bk_ref, bv_ref,
                     q_ref, k_ref, v_ref):
    x = x_ref[...].astype(_MXU_DTYPE)   # one x read feeds all three MXU passes
    q_ref[...] = jnp.dot(x, wq_ref[...].astype(_MXU_DTYPE),
                         preferred_element_type=jnp.float32) + bq_ref[...]
    k_ref[...] = jnp.dot(x, wk_ref[...].astype(_MXU_DTYPE),
                         preferred_element_type=jnp.float32) + bk_ref[...]
    v_ref[...] = jnp.dot(x, wv_ref[...].astype(_MXU_DTYPE),
                         preferred_element_type=jnp.float32) + bv_ref[...]


def qkv_proj(x, wq_t, wk_t, wv_t, bq, bk, bv, *, row_tile=256, col_tile=512):
    """x: (N, Din) -> q, k, v each (N, dim). Row- and column-tiled."""
    N, Din = x.shape
    dim = wq_t.shape[1]
    tm = _pick_tile(N, row_tile, 8)
    tn = _pick_tile(dim, col_tile, 128)
    # TODO(synk): add a K (Din) reduction grid axis + f32 VMEM accumulator for
    # very large Din instead of one full-depth contraction block.
    out = jax.ShapeDtypeStruct((N, dim), jnp.float32)
    w_spec = pl.BlockSpec((Din, tn), lambda i, j: (0, j))
    b_spec = pl.BlockSpec((1, tn), lambda i, j: (0, j))
    o_spec = pl.BlockSpec((tm, tn), lambda i, j: (i, j))
    return pl.pallas_call(
        _qkv_proj_kernel,
        out_shape=(out, out, out),
        grid=(N // tm, dim // tn),
        in_specs=[
            pl.BlockSpec((tm, Din), lambda i, j: (i, 0)),
            w_spec, w_spec, w_spec,
            b_spec, b_spec, b_spec,
        ],
        out_specs=(o_spec, o_spec, o_spec),
        compiler_params=_mosaic_params(("parallel", "parallel")),
    )(x, wq_t, wk_t, wv_t,
      bq.reshape(1, dim), bk.reshape(1, dim), bv.reshape(1, dim))


# ----------------------------- Linear kernel ------------------------------ #

def _linear_kernel(x_ref, w_ref, b_ref, o_ref):
    o_ref[...] = (
        jnp.dot(x_ref[...].astype(_MXU_DTYPE), w_ref[...].astype(_MXU_DTYPE),
                preferred_element_type=jnp.float32)
        + b_ref[...]
    )


def linear(x, w_t, b, *, row_tile=256, col_tile=512):
    """y = x @ w_t + b, row- and column-tiled, software-pipelined."""
    N, Din = x.shape
    Dout = w_t.shape[1]
    tm = _pick_tile(N, row_tile, 8)
    tn = _pick_tile(Dout, col_tile, 128)
    return pl.pallas_call(
        _linear_kernel,
        out_shape=jax.ShapeDtypeStruct((N, Dout), jnp.float32),
        grid=(N // tm, Dout // tn),
        in_specs=[
            pl.BlockSpec((tm, Din), lambda i, j: (i, 0)),
            pl.BlockSpec((Din, tn), lambda i, j: (0, j)),
            pl.BlockSpec((1, tn), lambda i, j: (0, j)),
        ],
        out_specs=pl.BlockSpec((tm, tn), lambda i, j: (i, j)),
        compiler_params=_mosaic_params(("parallel", "parallel")),
    )(x, w_t, b.reshape(1, Dout))


# ---------------------- Flash attention (ctx + lse) ------------------------ #

def _flash_attn_kernel(q_ref, k_ref, v_ref, o_ref, lse_ref,
                       m_ref, l_ref, acc_ref, *, num_heads, head_dim, scale):
    kv = pl.program_id(2)

    @pl.when(kv == 0)
    def _():
        m_ref[...] = jnp.full_like(m_ref, -jnp.inf)
        l_ref[...] = jnp.zeros_like(l_ref)
        acc_ref[...] = jnp.zeros_like(acc_ref)

    q_all = q_ref[0].astype(jnp.float32) * scale        # (tq, dim)
    k_all = k_ref[0]                                    # (tkv, dim)
    v_all = v_ref[0]                                    # (tkv, dim)

    for h in range(num_heads):                          # small static head loop
        lo = h * head_dim
        hi = lo + head_dim
        qh = q_all[:, lo:hi].astype(_MXU_DTYPE)
        kh = k_all[:, lo:hi].astype(_MXU_DTYPE)
        vh = v_all[:, lo:hi].astype(_MXU_DTYPE)

        # 'qd,kd->qk': contract last dims -> no in-kernel k transpose.
        s = lax.dot_general(qh, kh, (((1,), (1,)), ((), ())),
                            preferred_element_type=jnp.float32)  # (tq, tkv)

        m_prev = m_ref[h]                                        # (tq, 1)
        m_new = jnp.maximum(m_prev, jnp.max(s, axis=-1, keepdims=True))
        alpha = jnp.exp(m_prev - m_new)
        p = jnp.exp(s - m_new)
        l_ref[h] = alpha * l_ref[h] + jnp.sum(p, axis=-1, keepdims=True)
        acc_ref[h] = alpha * acc_ref[h] + jnp.dot(
            p.astype(_MXU_DTYPE), vh, preferred_element_type=jnp.float32)
        m_ref[h] = m_new

    @pl.when(kv == pl.num_programs(2) - 1)
    def _():
        ctx_parts = []
        lse_parts = []
        for h in range(num_heads):
            # TODO(synk): approx=True (EUP vrcp) once the caller's tolerance allows.
            inv = pl.reciprocal(l_ref[h], approx=False)
            ctx_parts.append(acc_ref[h] * inv)
            lse_parts.append(m_ref[h] + jnp.log(l_ref[h]))
        # Single lane-dense store per q tile (no per-head partial HBM stores).
        o_ref[0] = jnp.concatenate(ctx_parts, axis=-1).astype(o_ref.dtype)
        lse_ref[0] = jnp.concatenate(lse_parts, axis=-1)


def flash_attention(q, k, v, num_heads, *, q_tile=128, kv_tile=256):
    """q, k, v: (bsz, S, dim) -> (ctx (bsz, S, dim), lse (bsz, S, num_heads))."""
    bsz, S, dim = q.shape
    head_dim = dim // num_heads
    scale = 1.0 / math.sqrt(head_dim)
    tq = _pick_tile(S, q_tile, 8)
    tkv = _pick_tile(S, kv_tile, 128)
    kernel = functools.partial(_flash_attn_kernel, num_heads=num_heads,
                               head_dim=head_dim, scale=scale)
    return pl.pallas_call(
        kernel,
        out_shape=(
            jax.ShapeDtypeStruct((bsz, S, dim), jnp.float32),
            jax.ShapeDtypeStruct((bsz, S, num_heads), jnp.float32),
        ),
        grid=(bsz, S // tq, S // tkv),
        in_specs=[
            pl.BlockSpec((1, tq, dim), lambda b, t, kv: (b, t, 0)),
            pl.BlockSpec((1, tkv, dim), lambda b, t, kv: (b, kv, 0)),
            pl.BlockSpec((1, tkv, dim), lambda b, t, kv: (b, kv, 0)),
        ],
        out_specs=(
            pl.BlockSpec((1, tq, dim), lambda b, t, kv: (b, t, 0)),
            pl.BlockSpec((1, tq, num_heads), lambda b, t, kv: (b, t, 0)),
        ),
        scratch_shapes=[
            pltpu.VMEM((num_heads, tq, 1), jnp.float32),          # running max
            pltpu.VMEM((num_heads, tq, 1), jnp.float32),          # running sum
            pltpu.VMEM((num_heads, tq, head_dim), jnp.float32),   # ctx accumulator
        ],
        compiler_params=_mosaic_params(("parallel", "parallel", "arbitrary")),
    )(q, k, v)


# -------------- Head-averaged attention weights (need_weights) ------------- #

def _attn_weights_kernel(q_ref, k_ref, lse_ref, w_ref, *, num_heads, head_dim, scale):
    q_all = q_ref[0].astype(jnp.float32) * scale   # (tq, dim)
    k_all = k_ref[0]                               # (tkv, dim)
    lse = lse_ref[0]                               # (tq, H)
    for h in range(num_heads):
        lo = h * head_dim
        hi = lo + head_dim
        s = lax.dot_general(q_all[:, lo:hi].astype(_MXU_DTYPE),
                            k_all[:, lo:hi].astype(_MXU_DTYPE),
                            (((1,), (1,)), ((), ())),
                            preferred_element_type=jnp.float32)   # (tq, tkv)
        p = jnp.exp(s - lse[:, h:h + 1])           # exact softmax via lse
        # accumulate straight into the VMEM output tile (no spilled (tq,S) value)
        if h == 0:
            w_ref[0] = p
        else:
            w_ref[0] += p
    w_ref[0] = w_ref[0] * (1.0 / num_heads)


def attn_weights(q, k, lse, num_heads, *, q_tile=128, kv_tile=256):
    """Exact head-averaged softmax weights (bsz, S, S) from q, k and per-head lse."""
    bsz, S, dim = q.shape
    head_dim = dim // num_heads
    scale = 1.0 / math.sqrt(head_dim)
    tq = _pick_tile(S, q_tile, 8)
    tkv = _pick_tile(S, kv_tile, 128)
    kernel = functools.partial(_attn_weights_kernel, num_heads=num_heads,
                               head_dim=head_dim, scale=scale)
    return pl.pallas_call(
        kernel,
        out_shape=jax.ShapeDtypeStruct((bsz, S, S), jnp.float32),
        grid=(bsz, S // tq, S // tkv),
        in_specs=[
            pl.BlockSpec((1, tq, dim), lambda b, t, kv: (b, t, 0)),
            pl.BlockSpec((1, tkv, dim), lambda b, t, kv: (b, kv, 0)),
            pl.BlockSpec((1, tq, num_heads), lambda b, t, kv: (b, t, 0)),
        ],
        out_specs=pl.BlockSpec((1, tq, tkv), lambda b, t, kv: (b, t, kv)),
        compiler_params=_mosaic_params(("parallel", "parallel", "parallel")),
    )(q, k, lse)


# ------------------------------ Full module -------------------------------- #

def multihead_attention(x, params, num_heads, *, need_weights=True):
    """x: (tgt_len, bsz, dim). Returns (attn_output, avg_attn_weights or None)."""
    tgt, bsz, dim = x.shape
    assert dim % num_heads == 0

    # single small transpose to batch-major so all kernel blocks are lane-dense
    xb = jnp.transpose(x, (1, 0, 2)).reshape(bsz * tgt, dim)

    q, k, v = qkv_proj(xb, params["wq_t"], params["wk_t"], params["wv_t"],
                       params["bq"], params["bk"], params["bv"])
    q = q.reshape(bsz, tgt, dim)
    k = k.reshape(bsz, tgt, dim)
    v = v.reshape(bsz, tgt, dim)

    ctx, lse = flash_attention(q, k, v, num_heads)   # ctx: (bsz, tgt, dim)

    out = linear(ctx.reshape(bsz * tgt, dim), params["wo_t"], params["bo"])
    out = out.reshape(bsz, tgt, dim).transpose(1, 0, 2)   # back to (tgt, bsz, dim)

    w_avg = attn_weights(q, k, lse, num_heads) if need_weights else None
    return out, w_avg


# ------------------------------ Param init --------------------------------- #

def init_params(key, dim):
    """Xavier-uniform weights, uniform(+-1/sqrt(dim)) q/k/v biases (PyTorch
    Linear default), zero output bias — matches the module's init."""
    ks = jax.random.split(key, 7)
    limit_w = math.sqrt(6.0 / (dim + dim))
    limit_b = 1.0 / math.sqrt(dim)

    def xavier(k):
        # stored pre-transposed as (in, out) so kernels do x @ w_t
        return jax.random.uniform(k, (dim, dim), jnp.float32, -limit_w, limit_w)

    return {
        "wq_t": xavier(ks[0]),
        "wk_t": xavier(ks[1]),
        "wv_t": xavier(ks[2]),
        "wo_t": xavier(ks[3]),
        "bq": jax.random.uniform(ks[4], (dim,), jnp.float32, -limit_b, limit_b),
        "bk": jax.random.uniform(ks[5], (dim,), jnp.float32, -limit_b, limit_b),
        "bv": jax.random.uniform(ks[6], (dim,), jnp.float32, -limit_b, limit_b),
        "bo": jnp.zeros((dim,), jnp.float32),
    }


# ------------------------------- Reference --------------------------------- #

def reference(x, params, num_heads):
    tgt, bsz, dim = x.shape
    hd = dim // num_heads
    q = x @ params["wq_t"] + params["bq"]
    k = x @ params["wk_t"] + params["bk"]
    v = x @ params["wv_t"] + params["bv"]

    def to_bh(t):
        return t.reshape(tgt, bsz, num_heads, hd).transpose(1, 2, 0, 3)

    qb, kb, vb = to_bh(q) / math.sqrt(hd), to_bh(k), to_bh(v)
    s = jnp.einsum("bhqd,bhkd->bhqk", qb, kb)
    p = jax.nn.softmax(s, axis=-1)
    o = jnp.einsum("bhqk,bhkd->bhqd", p, vb)
    o = o.transpose(2, 0, 1, 3).reshape(tgt, bsz, dim)
    out = o @ params["wo_t"] + params["bo"]
    return out, p.mean(axis=1)


# --------------------------------- Main ------------------------------------ #

if __name__ == "__main__":
    # TODO(synk): dropout on attention weights (p=0.0 default) and the optional
    # attn_mask / key_padding_mask / bias_kv / add_zero_attn / rope branches are
    # not exercised (module defaults), so they are omitted.
    seq, batch, dim, num_heads = 8, 2, 32, 4

    key = jax.random.PRNGKey(0)
    kx, kp = jax.random.split(key)
    x = jax.random.normal(kx, (seq, batch, dim), jnp.float32)
    params = init_params(kp, dim)

    attn_out, attn_w = multihead_attention(x, params, num_heads)
    attn_out, attn_w = jax.block_until_ready((attn_out, attn_w))

    ref_out, ref_w = reference(x, params, num_heads)
    assert attn_out.shape == (seq, batch, dim)
    assert attn_w.shape == (batch, seq, seq)
    assert jnp.allclose(attn_out, ref_out, atol=1e-4, rtol=1e-4)
    assert jnp.allclose(attn_w, ref_w, atol=1e-4, rtol=1e-4)

    print("KERNEL_OK")
</pallas_src>

<mosaic_0001>
module attributes {stable_mosaic.version = 11 : i64} {
  func.func @_qkv_proj_kernel(%arg0: i32, %arg1: i32, %arg2: memref<16x32xf32, #tpu.memory_space<vmem>>, %arg3: memref<32x32xf32, #tpu.memory_space<vmem>>, %arg4: memref<32x32xf32, #tpu.memory_space<vmem>>, %arg5: memref<32x32xf32, #tpu.memory_space<vmem>>, %arg6: memref<1x32xf32, #tpu.memory_space<vmem>>, %arg7: memref<1x32xf32, #tpu.memory_space<vmem>>, %arg8: memref<1x32xf32, #tpu.memory_space<vmem>>, %arg9: memref<16x32xf32, #tpu.memory_space<vmem>>, %arg10: memref<16x32xf32, #tpu.memory_space<vmem>>, %arg11: memref<16x32xf32, #tpu.memory_space<vmem>>) attributes {dimension_semantics = [#tpu.dimension_semantics<parallel>, #tpu.dimension_semantics<parallel>], iteration_bounds = array<i64: 1, 1>, scalar_prefetch = 0 : i64, scratch_operands = 0 : i64, tpu.core_type = #tpu.core_type<tc>, window_params = [{transform_indices = @transform_0, window_bounds = array<i64: 16, 32>}, {transform_indices = @transform_1, window_bounds = array<i64: 32, 32>}, {transform_indices = @transform_2, window_bounds = array<i64: 32, 32>}, {transform_indices = @transform_3, window_bounds = array<i64: 32, 32>}, {transform_indices = @transform_4, window_bounds = array<i64: 1, 32>}, {transform_indices = @transform_5, window_bounds = array<i64: 1, 32>}, {transform_indices = @transform_6, window_bounds = array<i64: 1, 32>}, {transform_indices = @transform_7, window_bounds = array<i64: 16, 32>}, {transform_indices = @transform_8, window_bounds = array<i64: 16, 32>}, {transform_indices = @transform_9, window_bounds = array<i64: 16, 32>}]} {
    %c0 = arith.constant 0 : index
    %c0_0 = arith.constant 0 : index
    %0 = vector.load %arg2[%c0, %c0_0] : memref<16x32xf32, #tpu.memory_space<vmem>>, vector<16x32xf32>
    %c0_1 = arith.constant 0 : index
    %c0_2 = arith.constant 0 : index
    %1 = vector.load %arg3[%c0_1, %c0_2] : memref<32x32xf32, #tpu.memory_space<vmem>>, vector<32x32xf32>
    %cst = arith.constant dense<0.000000e+00> : vector<16x32xf32>
    %2 = tpu.matmul %0, %1, %cst {dimension_numbers = #tpu.dot_dimension_numbers<[1], [0], [0], [1], [0, 0, 1, 1], [], []>} : vector<16x32xf32>, vector<32x32xf32>, vector<16x32xf32> -> vector<16x32xf32>
    %c0_3 = arith.constant 0 : index
    %c0_4 = arith.constant 0 : index
    %3 = vector.load %arg6[%c0_3, %c0_4] : memref<1x32xf32, #tpu.memory_space<vmem>>, vector<1x32xf32>
    %4 = vector.broadcast %3 : vector<1x32xf32> to vector<16x32xf32>
    %5 = arith.addf %2, %4 : vector<16x32xf32>
    %c0_5 = arith.constant 0 : index
    %c0_6 = arith.constant 0 : index
    %6 = vector.load %arg9[%c0_5, %c0_6] : memref<16x32xf32, #tpu.memory_space<vmem>>, vector<16x32xf32>
    tpu.vector_store %arg9[%c0_5, %c0_6], %5 {strides = array<i32>} : memref<16x32xf32, #tpu.memory_space<vmem>>, vector<16x32xf32>,
    %c0_7 = arith.constant 0 : index
    %c0_8 = arith.constant 0 : index
    %7 = vector.load %arg4[%c0_7, %c0_8] : memref<32x32xf32, #tpu.memory_space<vmem>>, vector<32x32xf32>
    %cst_9 = arith.constant dense<0.000000e+00> : vector<16x32xf32>
    %8 = tpu.matmul %0, %7, %cst_9 {dimension_numbers = #tpu.dot_dimension_numbers<[1], [0], [0], [1], [0, 0, 1, 1], [], []>} : vector<16x32xf32>, vector<32x32xf32>, vector<16x32xf32> -> vector<16x32xf32>
    %c0_10 = arith.constant 0 : index
    %c0_11 = arith.constant 0 : index
    %9 = vector.load %arg7[%c0_10, %c0_11] : memref<1x32xf32, #tpu.memory_space<vmem>>, vector<1x32xf32>
    %10 = vector.broadcast %9 : vector<1x32xf32> to vector<16x32xf32>
    %11 = arith.addf %8, %10 : vector<16x32xf32>
    %c0_12 = arith.constant 0 : index
    %c0_13 = arith.constant 0 : index
    %12 = vector.load %arg10[%c0_12, %c0_13] : memref<16x32xf32, #tpu.memory_space<vmem>>, vector<16x32xf32>
    tpu.vector_store %arg10[%c0_12, %c0_13], %11 {strides = array<i32>} : memref<16x32xf32, #tpu.memory_space<vmem>>, vector<16x32xf32>,
    %c0_14 = arith.constant 0 : index
    %c0_15 = arith.constant 0 : index
    %13 = vector.load %arg5[%c0_14, %c0_15] : memref<32x32xf32, #tpu.memory_space<vmem>>, vector<32x32xf32>
    %cst_16 = arith.constant dense<0.000000e+00> : vector<16x32xf32>
    %14 = tpu.matmul %0, %13, %cst_16 {dimension_numbers = #tpu.dot_dimension_numbers<[1], [0], [0], [1], [0, 0, 1, 1], [], []>} : vector<16x32xf32>, vector<32x32xf32>, vector<16x32xf32> -> vector<16x32xf32>
    %c0_17 = arith.constant 0 : index
    %c0_18 = arith.constant 0 : index
    %15 = vector.load %arg8[%c0_17, %c0_18] : memref<1x32xf32, #tpu.memory_space<vmem>>, vector<1x32xf32>
    %16 = vector.broadcast %15 : vector<1x32xf32> to vector<16x32xf32>
    %17 = arith.addf %14, %16 : vector<16x32xf32>
    %c0_19 = arith.constant 0 : index
    %c0_20 = arith.constant 0 : index
    %18 = vector.load %arg11[%c0_19, %c0_20] : memref<16x32xf32, #tpu.memory_space<vmem>>, vector<16x32xf32>
    tpu.vector_store %arg11[%c0_19, %c0_20], %17 {strides = array<i32>} : memref<16x32xf32, #tpu.memory_space<vmem>>, vector<16x32xf32>,
    return
  }
  func.func @transform_0(%arg0: i32, %arg1: i32) -> (i32, i32) {
    %c0_i32 = arith.constant 0 : i32
    %c0_i32_0 = arith.constant 0 : i32
    return %arg0, %c0_i32 : i32, i32
  }
  func.func @transform_1(%arg0: i32, %arg1: i32) -> (i32, i32) {
    %c0_i32 = arith.constant 0 : i32
    %c0_i32_0 = arith.constant 0 : i32
    return %c0_i32, %arg1 : i32, i32
  }
  func.func @transform_2(%arg0: i32, %arg1: i32) -> (i32, i32) {
    %c0_i32 = arith.constant 0 : i32
    %c0_i32_0 = arith.constant 0 : i32
    return %c0_i32, %arg1 : i32, i32
  }
  func.func @transform_3(%arg0: i32, %arg1: i32) -> (i32, i32) {
    %c0_i32 = arith.constant 0 : i32
    %c0_i32_0 = arith.constant 0 : i32
    return %c0_i32, %arg1 : i32, i32
  }
  func.func @transform_4(%arg0: i32, %arg1: i32) -> (i32, i32) {
    %c0_i32 = arith.constant 0 : i32
    %c0_i32_0 = arith.constant 0 : i32
    return %c0_i32, %arg1 : i32, i32
  }
  func.func @transform_5(%arg0: i32, %arg1: i32) -> (i32, i32) {
    %c0_i32 = arith.constant 0 : i32
    %c0_i32_0 = arith.constant 0 : i32
    return %c0_i32, %arg1 : i32, i32
  }
  func.func @transform_6(%arg0: i32, %arg1: i32) -> (i32, i32) {
    %c0_i32 = arith.constant 0 : i32
    %c0_i32_0 = arith.constant 0 : i32
    return %c0_i32, %arg1 : i32, i32
  }
  func.func @transform_7(%arg0: i32, %arg1: i32) -> (i32, i32) {
    %c0_i32 = arith.constant 0 : i32
    return %arg0, %arg1 : i32, i32
  }
  func.func @transform_8(%arg0: i32, %arg1: i32) -> (i32, i32) {
    %c0_i32 = arith.constant 0 : i32
    return %arg0, %arg1 : i32, i32
  }
  func.func @transform_9(%arg0: i32, %arg1: i32) -> (i32, i32) {
    %c0_i32 = arith.constant 0 : i32
    return %arg0, %arg1 : i32, i32
  }
}

</mosaic_0001>

<bundles_post_ra>
// kernel: tpu_custom_call.1
= control target key start
LH: loop header
LB: loop body
LE: loop exit
PB: predicated region body
PF: predicated region fallthrough
CT: control target
= control target key end

     0   :  { %15 = vsyncpa [#allocation3], 0  ;;  %s872_s0 = inlined_call_operand.hbm [shape: f32[16,32], index: 0, kind: input, shape index: {}]   ;;  %s873_s1 = inlined_call_operand.hbm [shape: f32[32,32], index: 1, kind: input, shape index: {}]   ;;  %s874_s2 = inlined_call_operand.hbm [shape: f32[32,32], index: 2, kind: input, shape index: {}]   ;;  %s875_s3 = inlined_call_operand.hbm [shape: f32[32,32], index: 3, kind: input, shape index: {}]   ;;  %s876_s4 = inlined_call_operand.vmem [shape: f32[1,32], index: 4, kind: input, shape index: {}]   ;;  %s877_s5 = inlined_call_operand.vmem [shape: f32[1,32], index: 5, kind: input, shape index: {}]   ;;  %s878_s6 = inlined_call_operand.vmem [shape: f32[1,32], index: 6, kind: input, shape index: {}]   ;;  %s879_s7 = inlined_call_operand.hbm [shape: f32[16,32], index: 7, kind: output, shape index: {0}]   ;;  %s880_s8 = inlined_call_operand.hbm [shape: f32[16,32], index: 8, kind: output, shape index: {1}]   ;;  %s881_s9 = inlined_call_operand.hbm [shape: f32[16,32], index: 9, kind: output, shape index: {2}]  }
   0x1   :  { %16 = vsyncpa [#allocation6], 0 }
   0x2   :  { %17 = vsyncpa [#allocation9], 0 }
   0x3   :  { %18 = vsyncpa [#allocation4], 0 }
   0x4   :  { %19 = vsyncpa [#allocation12], 0  ;;  %s666_s30 = smov [#allocation5]   ;;  %s667_s11 = smov [#allocation2]  }
   0x5   :  { %s37_s10 = sshll.u32 %s666_s30, 4  ;;  %s25_s12 = sshll.u32 %s667_s11, 4  ;;  %s38_s10 = int_to_ptr.vmem [resolvable:$true] %s37_s10  ;;  %s725_s12 = int_to_ptr.vmem [resolvable:$true] %s25_s12 }
   0x6   :  { %s502_s15 = scalar_lea.hbm %s873_s1, 512 }
   0x7   :  { %p503_p0 = scmp.ne.s32.totalorder %s873_s1, %s502_s15  ;;  %p506_p1 = scmp.lt.u32.totalorder %s502_s15, %s873_s1 }
   0x9   :  { %p508_p2 = pnand %p506_p1, %p503_p0 }
   0xb   :  { %511 = shalt.err (!%p508_p2)
}
   0xc   :  { %s512_s20 = scalar_lea.vmem %s38_s10, 512  ;;  %p517_p4 = scmp.lt.s32.totalorder %s38_s10, %s38_s10 }
   0xd   :  { %p513_p3 = scmp.ne.s32.totalorder %s38_s10, %s512_s20  ;;  %p518_p5 = scmp.lt.s32.totalorder %s512_s20, %s512_s20 }
   0xf   :  { %p519_p6 = por %p518_p5, %p517_p4 }
  0x11   :  { %p520_p7 = pnand %p519_p6, %p513_p3 }
  0x13   :  { %523 = shalt.err (!%p520_p7)
}
  0x14   :  { %s668_s21 = smov 128   ;;  %s669_s22 = smov 8  }
  0x15   :  { %43 = dma.hbm_to_vmem [thread:$0]  %s873_s1, 512, %s38_s10, [#allocation6], %s668_s21, %s668_s21, %s669_s22  }
  0x16   :  { %s524_s27 = scalar_lea.hbm %s872_s0, 256 }
  0x17   :  { %p525_p8 = scmp.ne.s32.totalorder %s872_s0, %s524_s27  ;;  %p528_p9 = scmp.lt.u32.totalorder %s524_s27, %s872_s0 }
  0x19   :  { %p530_p10 = pnand %p528_p9, %p525_p8 }
  0x1b   :  { %533 = shalt.err (!%p530_p10)
}
  0x1c   :  { %s534_s13 = scalar_lea.vmem %s725_s12, 256  ;;  %p539_p12 = scmp.lt.s32.totalorder %s725_s12, %s725_s12 }
  0x1d   :  { %p535_p11 = scmp.ne.s32.totalorder %s725_s12, %s534_s13  ;;  %p540_p13 = scmp.lt.s32.totalorder %s534_s13, %s534_s13 }
  0x1f   :  { %p541_p0 = por %p540_p13, %p539_p12 }
  0x21   :  { %p542_p1 = pnand %p541_p0, %p535_p11 }
  0x23   :  { %545 = shalt.err (!%p542_p1)
}
  0x24   :  { %31 = dma.hbm_to_vmem [thread:$0]  %s872_s0, 256, %s725_s12, [#allocation3], %s668_s21, %s668_s21, %s669_s22  }
  0x25   :  { %s670_s14 = smov [#allocation7]   ;;  %s671_s16 = smov [#allocation8]  }
  0x26   :  { %s49_s15 = sshll.u32 %s670_s14, 4  ;;  %s61_s17 = sshll.u32 %s671_s16, 4  ;;  %s50_s15 = int_to_ptr.vmem [resolvable:$true] %s49_s15  ;;  %s762_s17 = int_to_ptr.vmem [resolvable:$true] %s61_s17 }
  0x27   :  { %s546_s20 = scalar_lea.hbm %s874_s2, 512 }
  0x28   :  { %p547_p2 = scmp.ne.s32.totalorder %s874_s2, %s546_s20  ;;  %p550_p3 = scmp.lt.u32.totalorder %s546_s20, %s874_s2 }
  0x2a   :  { %p552_p4 = pnand %p550_p3, %p547_p2 }
  0x2c   :  { %555 = shalt.err (!%p552_p4)
}
  0x2d   :  { %s556_s0 = scalar_lea.vmem %s50_s15, 512  ;;  %p561_p6 = scmp.lt.s32.totalorder %s50_s15, %s50_s15 }
  0x2e   :  { %p557_p5 = scmp.ne.s32.totalorder %s50_s15, %s556_s0  ;;  %p562_p7 = scmp.lt.s32.totalorder %s556_s0, %s556_s0 }
  0x30   :  { %p563_p8 = por %p562_p7, %p561_p6 }
  0x32   :  { %p564_p9 = pnand %p563_p8, %p557_p5 }
  0x34   :  { %567 = shalt.err (!%p564_p9)
}
  0x35   :  { %55 = dma.hbm_to_vmem [thread:$0]  %s874_s2, 512, %s50_s15, [#allocation6], %s668_s21, %s668_s21, %s669_s22  }
  0x36   :  { %s568_s30 = scalar_lea.hbm %s875_s3, 512 }
  0x37   :  { %p569_p10 = scmp.ne.s32.totalorder %s875_s3, %s568_s30  ;;  %p572_p11 = scmp.lt.u32.totalorder %s568_s30, %s875_s3 }
  0x39   :  { %p574_p12 = pnand %p572_p11, %p569_p10 }
  0x3b   :  { %577 = shalt.err (!%p574_p12)
}
  0x3c   :  { %s578_s14 = scalar_lea.vmem %s762_s17, 512  ;;  %p583_p0 = scmp.lt.s32.totalorder %s762_s17, %s762_s17 }
  0x3d   :  { %p579_p13 = scmp.ne.s32.totalorder %s762_s17, %s578_s14  ;;  %p584_p1 = scmp.lt.s32.totalorder %s578_s14, %s578_s14 }
  0x3f   :  { %p585_p2 = por %p584_p1, %p583_p0 }
  0x41   :  { %p586_p3 = pnand %p585_p2, %p579_p13 }
  0x43   :  { %589 = shalt.err (!%p586_p3)
}
  0x44   :  { %67 = dma.hbm_to_vmem [thread:$0]  %s875_s3, 512, %s762_s17, [#allocation9], %s668_s21, %s668_s21, %s669_s22  }
  0x45   :  { %656 = dma.done.wait [#allocation3], 256  }
  0x46   :  { %657 = vsyncadd [#allocation3], 4294967040 }
  0x47   :  { %658 = dma.done.wait [#allocation6], 1024  }
  0x48   :  { %659 = vsyncadd [#allocation6], 4294966272 }
  0x49   :  { %660 = dma.done.wait [#allocation9], 512  }
  0x4a   :  { %661 = vsyncadd [#allocation9], 4294966784  ;;  %v88_v0 = vld [vmem:[#allocation5] sm:$0xff]  ;;  %v89_v1 = vld [vmem:[#allocation5 + $0x8] sm:$0xff]  ;;  %vm99_vm0 = vcmask 261120   ;;  %s672_s19 = smov [#allocation10]  }
  0x4b   :  { %v90_v2 = vld [vmem:[#allocation5 + $0x10] sm:$0xff]  ;;  %v469_v3 = vpack.c.bf16 %v89_v1, %v88_v0  ;;  %v91_v4 = vld [vmem:[#allocation5 + $0x18] sm:$0xff]  ;;  %v183_v5 = vld [vmem:[#allocation7] sm:$0xff]  ;;  %s364_s20 = sshll.u32 %s672_s19, 4  ;;  %s673_s23 = smov [#allocation11]   ;;  %s365_s20 = int_to_ptr.vmem [resolvable:$true] %s364_s20 }
  0x4c   :  { %v184_v6 = vld [vmem:[#allocation7 + $0x8] sm:$0xff]  ;;  %v473_v7 = vpack.c.bf16 %v91_v4, %v90_v2  ;;  %v86_v9 = vld [vmem:[#allocation2] sm:$0xff]  ;;  %v271_v10 = vld [vmem:[#allocation8] sm:$0xff]  ;;  %s376_s24 = sshll.u32 %s673_s23, 4  ;;  %s590_s25 = scalar_lea.vmem %s365_s20, 256  ;;  %s812_s24 = int_to_ptr.vmem [resolvable:$true] %s376_s24 }
  0x4d   :  { %v477_v8 = vpack.c.bf16 %v184_v6, %v183_v5  ;;  %470 = vmatprep.subr.bf16.mxu0 %v469_v3  ;;  %444 = vmatprep.mubr.msk.f32.mxu0 %vm99_vm0, %v86_v9  ;;  %v272_v11 = vld [vmem:[#allocation8 + $0x8] sm:$0xff]  ;;  %v185_v12 = vld [vmem:[#allocation7 + $0x10] sm:$0xff]  ;;  %v186_v13 = vld [vmem:[#allocation7 + $0x18] sm:$0xff]  ;;  %p591_p4 = scmp.ne.s32.totalorder %s365_s20, %s590_s25  ;;  %p595_p5 = scmp.lt.s32.totalorder %s365_s20, %s365_s20 }
  0x4e   :  { %472 = vmatpush3.bf16.msra.mxu0 %v469_v3  ;;  %v481_v14 = vpack.c.bf16 %v186_v13, %v185_v12  ;;  %v485_v15 = vpack.c.bf16 %v272_v11, %v271_v10  ;;  %v273_v16 = vld [vmem:[#allocation8 + $0x10] sm:$0xff]  ;;  %v274_v17 = vld [vmem:[#allocation8 + $0x18] sm:$0xff]  ;;  %455 = vmatprep.mubr.msk.f32.mxu1 %vm99_vm0, %v86_v9  ;;  %p596_p6 = scmp.lt.s32.totalorder %s590_s25, %s590_s25 }
  0x4f   :  { %478 = vmatprep.subr.bf16.mxu1 %v477_v8  ;;  %474 = vmatprep.subr.bf16.mxu0 %v473_v7  ;;  %v87_v18 = vld [vmem:[#allocation2 + $0x8] sm:$0xff]  ;;  %v489_v19 = vpack.c.bf16 %v274_v17, %v273_v16  ;;  %v409_v20 = vld [vmem:[%s876_s4] ss:$0 sm:$0xff] }
  0x50   :  { %480 = vmatpush3.bf16.msra.mxu1 %v477_v8  ;;  %v412_v21 = vld [vmem:[%s877_s5] ss:$0 sm:$0xff]  ;;  %p597_p7 = por %p596_p6, %p595_p5 }
  0x51   :  { %482 = vmatprep.subr.bf16.mxu1 %v481_v14  ;;  %v415_v30 = vld [vmem:[%s878_s6] ss:$0 sm:$0xff] }
  0x52   :  { %476 = vmatpush3.bf16.msra.mxu0 %v473_v7  ;;  %p598_p8 = pnand %p597_p7, %p591_p4 }
  0x53   :  { %486 = vmatprep.subr.bf16.mxu0 %v485_v15 }
  0x54   :  { %484 = vmatpush3.bf16.msra.mxu1 %v481_v14 }
  0x55   :  { %445 = vmatmul.mubr.msk.f32.vlgmr.msra.gmra.mrb[0].mxu0 %vm99_vm0, %v87_v18 }
  0x56   :  { %488 = vmatpush3.bf16.msra.mxu0 %v485_v15  ;;  %466 = vmatprep.mubr.msk.f32.mxu0 %vm99_vm0, %v86_v9 }
  0x57   :  { %456 = vmatmul.mubr.msk.f32.vlgmr.msra.gmra.mrb[0].mxu1 %vm99_vm0, %v87_v18  ;;  %490 = vmatprep.subr.bf16.mxu0 %v489_v19 }
  0x5a   :  { %492 = vmatpush3.bf16.msra.mxu0 %v489_v19 }
  0x5d   :  { %467 = vmatmul.mubr.msk.f32.vlgmr.msra.gmra.mrb[2].mxu0 %vm99_vm0, %v87_v18 }
 0x128   :  { %v446_v22 = vpop.f32.mrb[0].mxu0 }
 0x129   :  { %v178_v23 = vadd.f32 %v446_v22, %v409_v20  ;;  %v172_v24 = vpop.f32.mrb[1].mxu0 }
 0x12a   :  { %v457_v25 = vpop.f32.mrb[0].mxu1  ;;  %v173_v26 = vadd.f32 %v409_v20, %v172_v24 }
 0x12b   :  { %v266_v27 = vadd.f32 %v457_v25, %v412_v21  ;;  %v260_v28 = vpop.f32.mrb[1].mxu1  ;;  %182 = vst.msk [vmem:[#allocation10 + $0x8] sm:$0xff] %vm99_vm0, %v178_v23 }
 0x12c   :  { %v261_v29 = vadd.f32 %v412_v21, %v260_v28  ;;  %181 = vst.msk [vmem:[#allocation10] sm:$0xff] %vm99_vm0, %v173_v26 }
 0x12d   :  { %270 = vst.msk [vmem:[#allocation11 + $0x8] sm:$0xff] %vm99_vm0, %v266_v27 }
 0x12e   :  { %269 = vst.msk [vmem:[#allocation11] sm:$0xff] %vm99_vm0, %v261_v29 }
 0x12f   :  { %601 = shalt.err (!%p598_p8)
}
 0x130   :  { %s602_s12 = scalar_lea.hbm %s879_s7, 256 }
 0x131   :  { %p603_p9 = scmp.ne.s32.totalorder %s879_s7, %s602_s12  ;;  %p606_p10 = scmp.lt.u32.totalorder %s602_s12, %s879_s7 }
 0x133   :  { %p608_p11 = pnand %p606_p10, %p603_p9 }
 0x135   :  { %611 = shalt.err (!%p608_p11)
}
 0x136   :  { %370 = dma.vmem_to_hbm [thread:$0]  %s365_s20, 256, %s879_s7, [#allocation4], %s668_s21, %s668_s21, %s669_s22  }
 0x137   :  { %s612_s13 = scalar_lea.vmem %s812_s24, 256  ;;  %p617_p13 = scmp.lt.s32.totalorder %s812_s24, %s812_s24 }
 0x138   :  { %p613_p12 = scmp.ne.s32.totalorder %s812_s24, %s612_s13  ;;  %p618_p0 = scmp.lt.s32.totalorder %s612_s13, %s612_s13 }
 0x13a   :  { %p619_p1 = por %p618_p0, %p617_p13 }
 0x13c   :  { %p620_p2 = pnand %p619_p1, %p613_p12 }
 0x13e   :  { %623 = shalt.err (!%p620_p2)
}
 0x13f   :  { %s624_s14 = scalar_lea.hbm %s880_s8, 256 }
 0x140   :  { %p625_p3 = scmp.ne.s32.totalorder %s880_s8, %s624_s14  ;;  %p628_p4 = scmp.lt.u32.totalorder %s624_s14, %s880_s8 }
 0x142   :  { %p630_p5 = pnand %p628_p4, %p625_p3 }
 0x144   :  { %633 = shalt.err (!%p630_p5)
}
 0x145   :  { %382 = dma.vmem_to_hbm [thread:$0]  %s812_s24, 256, %s880_s8, [#allocation12], %s668_s21, %s668_s21, %s669_s22   ;;  %v468_v31 = vpop.f32.mrb[2].mxu0 }
 0x146   :  { %s674_s18 = smov [#allocation13]   ;;  %v354_v32 = vadd.f32 %v468_v31, %v415_v30  ;;  %v348_v33 = vpop.f32.mrb[3].mxu0 }
 0x147   :  { %s388_s19 = sshll.u32 %s674_s18, 4  ;;  %v349_v34 = vadd.f32 %v415_v30, %v348_v33  ;;  %s389_s19 = int_to_ptr.vmem [resolvable:$true] %s388_s19 }
 0x148   :  { %358 = vst.msk [vmem:[#allocation13 + $0x8] sm:$0xff] %vm99_vm0, %v354_v32  ;;  %s634_s20 = scalar_lea.vmem %s389_s19, 256  ;;  %p639_p7 = scmp.lt.s32.totalorder %s389_s19, %s389_s19 }
 0x149   :  { %357 = vst.msk [vmem:[#allocation13] sm:$0xff] %vm99_vm0, %v349_v34  ;;  %p635_p6 = scmp.ne.s32.totalorder %s389_s19, %s634_s20  ;;  %p640_p8 = scmp.lt.s32.totalorder %s634_s20, %s634_s20 }
 0x14b   :  { %p641_p9 = por %p640_p8, %p639_p7 }
 0x14d   :  { %p642_p10 = pnand %p641_p9, %p635_p6 }
 0x14f   :  { %645 = shalt.err (!%p642_p10)
}
 0x150   :  { %s646_s24 = scalar_lea.hbm %s881_s9, 256 }
 0x151   :  { %p647_p11 = scmp.ne.s32.totalorder %s881_s9, %s646_s24  ;;  %p650_p12 = scmp.lt.u32.totalorder %s646_s24, %s881_s9 }
 0x153   :  { %p652_p13 = pnand %p650_p12, %p647_p11 }
 0x155   :  { %655 = shalt.err (!%p652_p13)
}
 0x156   :  { %394 = dma.vmem_to_hbm [thread:$0]  %s389_s19, 256, %s881_s9, [#allocation12], %s668_s21, %s668_s21, %s669_s22  }
 0x157   :  { %662 = dma.done.wait [#allocation4], 256  }
 0x158   :  { %663 = vsyncadd [#allocation4], 4294967040 }
 0x159   :  { %664 = dma.done.wait [#allocation12], 512  }
 0x15a   :  { %665 = vsyncadd [#allocation12], 4294966784 }
 0x15b   :  { %404 = vsyncpa [#allocation3], 1 }
 0x15c   :  { %405 = vsyncpa [#allocation6], 1 }
 0x15d   :  { %406 = vsyncpa [#allocation9], 1 }
 0x15e   :  { %407 = vsyncpa [#allocation4], 1 }
 0x15f   :  { %408 = vsyncpa [#allocation12], 1 }

</bundles_post_ra>
